<compile_context>
chip_gen: v7x
topology: tpu7x:2x2x1
jax: 0.10.0
libtpu: 0.0.40
codegen_flags: <defaults>
</compile_context>

<pallas_src>
import math

import jax
import jax.numpy as jnp
from jax.experimental import pallas as pl
from jax.experimental.pallas import tpu as pltpu

LANE = 128             # lane width (last-dim vector granule)
DEFAULT_TILE_B = 4096  # batch lanes per grid step (review suggests 2048-8192)


def _round_up(x, m):
    return (x + m - 1) // m * m


def _choose_tile_b(B, tile_b):
    """Pick a lane-dense batch tile. Keeps tile <= B and the grid >= ~8 steps."""
    if B <= LANE:
        # Single block; block dim == full array dim is legal even if not a
        # multiple of 128 (tiny-batch / unit-test path).
        return B
    # Keep roughly >= 8 grid steps so v7x's two TensorCores both get work and
    # per-step DMA overlaps compute; never below one full 128-lane vreg.
    cap = _round_up(pl.cdiv(B, 8), LANE)
    tb = max(LANE, min(tile_b, cap))
    # Stay <= B (the tail block may still be partial; that is handled by Pallas).
    return min(tb, (B // LANE) * LANE)


def _linear_sigmoid_kernel(w_ref, b_ref, xt_ref, ot_ref):
    # w_ref: (n_targets, n_dims) f32 in SMEM (scalar reads)
    # b_ref: (n_targets,)        f32 in SMEM
    # xt_ref: (n_dims, TILE_B)   f32 in VMEM  -- batch on the lane axis
    # ot_ref: (n_targets, TILE_B) f32 in VMEM
    n_targets, n_dims = w_ref.shape
    for j in range(n_targets):                       # static, tiny (3)
        z = w_ref[j, 0] * xt_ref[pl.ds(0, 1), :]     # (1, TILE_B) on the VPU
        for k in range(1, n_dims):                   # static, tiny (5)
            z = z + w_ref[j, k] * xt_ref[pl.ds(k, 1), :]
        z = z + b_ref[j]
        # sigmoid only over the real output row j (exp on EUP, exact divide).
        ot_ref[pl.ds(j, 1), :] = (1.0 / (1.0 + jnp.exp(-z))).astype(ot_ref.dtype)


def subneuron2_forward(x, w, b, *, tile_b=DEFAULT_TILE_B):
    """sigmoid(x @ w.T + b).  x: [B, n_dims] f32, w: [n_targets, n_dims], b: [n_targets]."""
    B, n_dims = x.shape
    n_targets = w.shape[0]

    xt = x.T                                   # (n_dims, B): batch on the lane axis
    tb = _choose_tile_b(B, tile_b)
    grid = (pl.cdiv(B, tb),)                   # partial tail block allowed

    out_t = pl.pallas_call(
        _linear_sigmoid_kernel,
        out_shape=jax.ShapeDtypeStruct((n_targets, B), jnp.float32),
        grid=grid,
        in_specs=[
            pl.BlockSpec(memory_space=pltpu.MemorySpace.SMEM),   # W: 3x5 scalars
            pl.BlockSpec(memory_space=pltpu.MemorySpace.SMEM),   # b: 3 scalars
            pl.BlockSpec((n_dims, tb), lambda i: (0, i)),        # x^T batch tiles
        ],
        out_specs=pl.BlockSpec((n_targets, tb), lambda i: (0, i)),
        compiler_params=pltpu.CompilerParams(
            # Batch tiles are independent -> shard the grid across v7x's 2 TCs.
            dimension_semantics=("parallel",),
        ),
    )(w, b, xt)

    return out_t.T                             # back to (B, n_targets)


def init_params(key, n_dims=5, n_targets=3):
    # Matches torch.nn.Linear default init U(-1/sqrt(n_dims), 1/sqrt(n_dims)).
    kw, kb = jax.random.split(key)
    bound = 1.0 / math.sqrt(n_dims)
    w = jax.random.uniform(kw, (n_targets, n_dims), jnp.float32, -bound, bound)
    b = jax.random.uniform(kb, (n_targets,), jnp.float32, -bound, bound)
    return w, b


if __name__ == "__main__":
    n_dims, n_targets = 5, 3
    key = jax.random.PRNGKey(0)
    kx, kp, kx2 = jax.random.split(key, 3)
    w, b = init_params(kp, n_dims, n_targets)

    # Small shape matching the original example (batch=8).
    x = jax.random.normal(kx, (8, n_dims), dtype=jnp.float32)
    out = subneuron2_forward(x, w, b)
    jax.block_until_ready(out)
    ref = jax.nn.sigmoid(x @ w.T + b)
    assert out.shape == (8, n_targets)
    assert jnp.allclose(out, ref, atol=1e-5, rtol=1e-5), "mismatch vs reference (B=8)"

    # Also exercise the tiled path (multiple grid steps + partial tail block).
    x2 = jax.random.normal(kx2, (300, n_dims), dtype=jnp.float32)
    out2 = subneuron2_forward(x2, w, b)
    jax.block_until_ready(out2)
    ref2 = jax.nn.sigmoid(x2 @ w.T + b)
    assert out2.shape == (300, n_targets)
    assert jnp.allclose(out2, ref2, atol=1e-5, rtol=1e-5), "mismatch vs reference (B=300)"

    print("KERNEL_OK")
</pallas_src>

<mosaic_0001>
module attributes {stable_mosaic.version = 11 : i64} {
  func.func @_linear_sigmoid_kernel(%arg0: i32, %arg1: memref<3x5xf32, #tpu.memory_space<smem>>, %arg2: memref<3xf32, #tpu.memory_space<smem>>, %arg3: memref<5x8xf32, #tpu.memory_space<vmem>>, %arg4: memref<3x8xf32, #tpu.memory_space<vmem>>) attributes {dimension_semantics = [#tpu.dimension_semantics<parallel>], iteration_bounds = array<i64: 1>, scalar_prefetch = 0 : i64, scratch_operands = 0 : i64, tpu.core_type = #tpu.core_type<tc>, window_params = [{transform_indices = @transform_0, window_bounds = array<i64: 3, 5>}, {transform_indices = @transform_1, window_bounds = array<i64: 3>}, {transform_indices = @transform_2, window_bounds = array<i64: 5, 8>}, {transform_indices = @transform_3, window_bounds = array<i64: 3, 8>}]} {
    %c0 = arith.constant 0 : index
    %c0_0 = arith.constant 0 : index
    %0 = memref.load %arg1[%c0, %c0_0] : memref<3x5xf32, #tpu.memory_space<smem>>
    %c0_1 = arith.constant 0 : index
    %c0_2 = arith.constant 0 : index
    %1 = vector.load %arg3[%c0_1, %c0_2] : memref<5x8xf32, #tpu.memory_space<vmem>>, vector<1x8xf32>
    %2 = vector.broadcast %0 : f32 to vector<1x8xf32>
    %3 = arith.mulf %2, %1 : vector<1x8xf32>
    %c0_3 = arith.constant 0 : index
    %c1 = arith.constant 1 : index
    %4 = memref.load %arg1[%c0_3, %c1] : memref<3x5xf32, #tpu.memory_space<smem>>
    %c1_4 = arith.constant 1 : index
    %c0_5 = arith.constant 0 : index
    %5 = vector.load %arg3[%c1_4, %c0_5] : memref<5x8xf32, #tpu.memory_space<vmem>>, vector<1x8xf32>
    %6 = vector.broadcast %4 : f32 to vector<1x8xf32>
    %7 = arith.mulf %6, %5 : vector<1x8xf32>
    %8 = arith.addf %3, %7 : vector<1x8xf32>
    %c0_6 = arith.constant 0 : index
    %c2 = arith.constant 2 : index
    %9 = memref.load %arg1[%c0_6, %c2] : memref<3x5xf32, #tpu.memory_space<smem>>
    %c2_7 = arith.constant 2 : index
    %c0_8 = arith.constant 0 : index
    %10 = vector.load %arg3[%c2_7, %c0_8] : memref<5x8xf32, #tpu.memory_space<vmem>>, vector<1x8xf32>
    %11 = vector.broadcast %9 : f32 to vector<1x8xf32>
    %12 = arith.mulf %11, %10 : vector<1x8xf32>
    %13 = arith.addf %8, %12 : vector<1x8xf32>
    %c0_9 = arith.constant 0 : index
    %c3 = arith.constant 3 : index
    %14 = memref.load %arg1[%c0_9, %c3] : memref<3x5xf32, #tpu.memory_space<smem>>
    %c3_10 = arith.constant 3 : index
    %c0_11 = arith.constant 0 : index
    %15 = vector.load %arg3[%c3_10, %c0_11] : memref<5x8xf32, #tpu.memory_space<vmem>>, vector<1x8xf32>
    %16 = vector.broadcast %14 : f32 to vector<1x8xf32>
    %17 = arith.mulf %16, %15 : vector<1x8xf32>
    %18 = arith.addf %13, %17 : vector<1x8xf32>
    %c0_12 = arith.constant 0 : index
    %c4 = arith.constant 4 : index
    %19 = memref.load %arg1[%c0_12, %c4] : memref<3x5xf32, #tpu.memory_space<smem>>
    %c4_13 = arith.constant 4 : index
    %c0_14 = arith.constant 0 : index
    %20 = vector.load %arg3[%c4_13, %c0_14] : memref<5x8xf32, #tpu.memory_space<vmem>>, vector<1x8xf32>
    %21 = vector.broadcast %19 : f32 to vector<1x8xf32>
    %22 = arith.mulf %21, %20 : vector<1x8xf32>
    %23 = arith.addf %18, %22 : vector<1x8xf32>
    %c0_15 = arith.constant 0 : index
    %24 = memref.load %arg2[%c0_15] : memref<3xf32, #tpu.memory_space<smem>>
    %25 = vector.broadcast %24 : f32 to vector<1x8xf32>
    %26 = arith.addf %23, %25 : vector<1x8xf32>
    %cst = arith.constant 0.000000e+00 : f32
    %27 = vector.broadcast %cst : f32 to vector<1x8xf32>
    %28 = arith.subf %27, %26 : vector<1x8xf32>
    %29 = math.exp %28 : vector<1x8xf32>
    %cst_16 = arith.constant 1.000000e+00 : f32
    %30 = vector.broadcast %cst_16 : f32 to vector<1x8xf32>
    %31 = arith.addf %30, %29 : vector<1x8xf32>
    %cst_17 = arith.constant 1.000000e+00 : f32
    %32 = vector.broadcast %cst_17 : f32 to vector<1x8xf32>
    %33 = arith.divf %32, %31 : vector<1x8xf32>
    %c0_18 = arith.constant 0 : index
    %c0_19 = arith.constant 0 : index
    %34 = vector.load %arg4[%c0_18, %c0_19] : memref<3x8xf32, #tpu.memory_space<vmem>>, vector<1x8xf32>
    tpu.vector_store %arg4[%c0_18, %c0_19], %33 {strides = array<i32>} : memref<3x8xf32, #tpu.memory_space<vmem>>, vector<1x8xf32>,
    %c1_20 = arith.constant 1 : index
    %c0_21 = arith.constant 0 : index
    %35 = memref.load %arg1[%c1_20, %c0_21] : memref<3x5xf32, #tpu.memory_space<smem>>
    %c0_22 = arith.constant 0 : index
    %c0_23 = arith.constant 0 : index
    %36 = vector.load %arg3[%c0_22, %c0_23] : memref<5x8xf32, #tpu.memory_space<vmem>>, vector<1x8xf32>
    %37 = vector.broadcast %35 : f32 to vector<1x8xf32>
    %38 = arith.mulf %37, %36 : vector<1x8xf32>
    %c1_24 = arith.constant 1 : index
    %c1_25 = arith.constant 1 : index
    %39 = memref.load %arg1[%c1_24, %c1_25] : memref<3x5xf32, #tpu.memory_space<smem>>
    %c1_26 = arith.constant 1 : index
    %c0_27 = arith.constant 0 : index
    %40 = vector.load %arg3[%c1_26, %c0_27] : memref<5x8xf32, #tpu.memory_space<vmem>>, vector<1x8xf32>
    %41 = vector.broadcast %39 : f32 to vector<1x8xf32>
    %42 = arith.mulf %41, %40 : vector<1x8xf32>
    %43 = arith.addf %38, %42 : vector<1x8xf32>
    %c1_28 = arith.constant 1 : index
    %c2_29 = arith.constant 2 : index
    %44 = memref.load %arg1[%c1_28, %c2_29] : memref<3x5xf32, #tpu.memory_space<smem>>
    %c2_30 = arith.constant 2 : index
    %c0_31 = arith.constant 0 : index
    %45 = vector.load %arg3[%c2_30, %c0_31] : memref<5x8xf32, #tpu.memory_space<vmem>>, vector<1x8xf32>
    %46 = vector.broadcast %44 : f32 to vector<1x8xf32>
    %47 = arith.mulf %46, %45 : vector<1x8xf32>
    %48 = arith.addf %43, %47 : vector<1x8xf32>
    %c1_32 = arith.constant 1 : index
    %c3_33 = arith.constant 3 : index
    %49 = memref.load %arg1[%c1_32, %c3_33] : memref<3x5xf32, #tpu.memory_space<smem>>
    %c3_34 = arith.constant 3 : index
    %c0_35 = arith.constant 0 : index
    %50 = vector.load %arg3[%c3_34, %c0_35] : memref<5x8xf32, #tpu.memory_space<vmem>>, vector<1x8xf32>
    %51 = vector.broadcast %49 : f32 to vector<1x8xf32>
    %52 = arith.mulf %51, %50 : vector<1x8xf32>
    %53 = arith.addf %48, %52 : vector<1x8xf32>
    %c1_36 = arith.constant 1 : index
    %c4_37 = arith.constant 4 : index
    %54 = memref.load %arg1[%c1_36, %c4_37] : memref<3x5xf32, #tpu.memory_space<smem>>
    %c4_38 = arith.constant 4 : index
    %c0_39 = arith.constant 0 : index
    %55 = vector.load %arg3[%c4_38, %c0_39] : memref<5x8xf32, #tpu.memory_space<vmem>>, vector<1x8xf32>
    %56 = vector.broadcast %54 : f32 to vector<1x8xf32>
    %57 = arith.mulf %56, %55 : vector<1x8xf32>
    %58 = arith.addf %53, %57 : vector<1x8xf32>
    %c1_40 = arith.constant 1 : index
    %59 = memref.load %arg2[%c1_40] : memref<3xf32, #tpu.memory_space<smem>>
    %60 = vector.broadcast %59 : f32 to vector<1x8xf32>
    %61 = arith.addf %58, %60 : vector<1x8xf32>
    %cst_41 = arith.constant 0.000000e+00 : f32
    %62 = vector.broadcast %cst_41 : f32 to vector<1x8xf32>
    %63 = arith.subf %62, %61 : vector<1x8xf32>
    %64 = math.exp %63 : vector<1x8xf32>
    %cst_42 = arith.constant 1.000000e+00 : f32
    %65 = vector.broadcast %cst_42 : f32 to vector<1x8xf32>
    %66 = arith.addf %65, %64 : vector<1x8xf32>
    %cst_43 = arith.constant 1.000000e+00 : f32
    %67 = vector.broadcast %cst_43 : f32 to vector<1x8xf32>
    %68 = arith.divf %67, %66 : vector<1x8xf32>
    %c1_44 = arith.constant 1 : index
    %c0_45 = arith.constant 0 : index
    %69 = vector.load %arg4[%c1_44, %c0_45] : memref<3x8xf32, #tpu.memory_space<vmem>>, vector<1x8xf32>
    tpu.vector_store %arg4[%c1_44, %c0_45], %68 {strides = array<i32>} : memref<3x8xf32, #tpu.memory_space<vmem>>, vector<1x8xf32>,
    %c2_46 = arith.constant 2 : index
    %c0_47 = arith.constant 0 : index
    %70 = memref.load %arg1[%c2_46, %c0_47] : memref<3x5xf32, #tpu.memory_space<smem>>
    %c0_48 = arith.constant 0 : index
    %c0_49 = arith.constant 0 : index
    %71 = vector.load %arg3[%c0_48, %c0_49] : memref<5x8xf32, #tpu.memory_space<vmem>>, vector<1x8xf32>
    %72 = vector.broadcast %70 : f32 to vector<1x8xf32>
    %73 = arith.mulf %72, %71 : vector<1x8xf32>
    %c2_50 = arith.constant 2 : index
    %c1_51 = arith.constant 1 : index
    %74 = memref.load %arg1[%c2_50, %c1_51] : memref<3x5xf32, #tpu.memory_space<smem>>
    %c1_52 = arith.constant 1 : index
    %c0_53 = arith.constant 0 : index
    %75 = vector.load %arg3[%c1_52, %c0_53] : memref<5x8xf32, #tpu.memory_space<vmem>>, vector<1x8xf32>
    %76 = vector.broadcast %74 : f32 to vector<1x8xf32>
    %77 = arith.mulf %76, %75 : vector<1x8xf32>
    %78 = arith.addf %73, %77 : vector<1x8xf32>
    %c2_54 = arith.constant 2 : index
    %c2_55 = arith.constant 2 : index
    %79 = memref.load %arg1[%c2_54, %c2_55] : memref<3x5xf32, #tpu.memory_space<smem>>
    %c2_56 = arith.constant 2 : index
    %c0_57 = arith.constant 0 : index
    %80 = vector.load %arg3[%c2_56, %c0_57] : memref<5x8xf32, #tpu.memory_space<vmem>>, vector<1x8xf32>
    %81 = vector.broadcast %79 : f32 to vector<1x8xf32>
    %82 = arith.mulf %81, %80 : vector<1x8xf32>
    %83 = arith.addf %78, %82 : vector<1x8xf32>
    %c2_58 = arith.constant 2 : index
    %c3_59 = arith.constant 3 : index
    %84 = memref.load %arg1[%c2_58, %c3_59] : memref<3x5xf32, #tpu.memory_space<smem>>
    %c3_60 = arith.constant 3 : index
    %c0_61 = arith.constant 0 : index
    %85 = vector.load %arg3[%c3_60, %c0_61] : memref<5x8xf32, #tpu.memory_space<vmem>>, vector<1x8xf32>
    %86 = vector.broadcast %84 : f32 to vector<1x8xf32>
    %87 = arith.mulf %86, %85 : vector<1x8xf32>
    %88 = arith.addf %83, %87 : vector<1x8xf32>
    %c2_62 = arith.constant 2 : index
    %c4_63 = arith.constant 4 : index
    %89 = memref.load %arg1[%c2_62, %c4_63] : memref<3x5xf32, #tpu.memory_space<smem>>
    %c4_64 = arith.constant 4 : index
    %c0_65 = arith.constant 0 : index
    %90 = vector.load %arg3[%c4_64, %c0_65] : memref<5x8xf32, #tpu.memory_space<vmem>>, vector<1x8xf32>
    %91 = vector.broadcast %89 : f32 to vector<1x8xf32>
    %92 = arith.mulf %91, %90 : vector<1x8xf32>
    %93 = arith.addf %88, %92 : vector<1x8xf32>
    %c2_66 = arith.constant 2 : index
    %94 = memref.load %arg2[%c2_66] : memref<3xf32, #tpu.memory_space<smem>>
    %95 = vector.broadcast %94 : f32 to vector<1x8xf32>
    %96 = arith.addf %93, %95 : vector<1x8xf32>
    %cst_67 = arith.constant 0.000000e+00 : f32
    %97 = vector.broadcast %cst_67 : f32 to vector<1x8xf32>
    %98 = arith.subf %97, %96 : vector<1x8xf32>
    %99 = math.exp %98 : vector<1x8xf32>
    %cst_68 = arith.constant 1.000000e+00 : f32
    %100 = vector.broadcast %cst_68 : f32 to vector<1x8xf32>
    %101 = arith.addf %100, %99 : vector<1x8xf32>
    %cst_69 = arith.constant 1.000000e+00 : f32
    %102 = vector.broadcast %cst_69 : f32 to vector<1x8xf32>
    %103 = arith.divf %102, %101 : vector<1x8xf32>
    %c2_70 = arith.constant 2 : index
    %c0_71 = arith.constant 0 : index
    %104 = vector.load %arg4[%c2_70, %c0_71] : memref<3x8xf32, #tpu.memory_space<vmem>>, vector<1x8xf32>
    tpu.vector_store %arg4[%c2_70, %c0_71], %103 {strides = array<i32>} : memref<3x8xf32, #tpu.memory_space<vmem>>, vector<1x8xf32>,
    return
  }
  func.func @transform_0(%arg0: i32) -> (i32, i32) {
    %c0_i32 = arith.constant 0 : i32
    %c0_i32_0 = arith.constant 0 : i32
    %c0_i32_1 = arith.constant 0 : i32
    return %c0_i32, %c0_i32_0 : i32, i32
  }
  func.func @transform_1(%arg0: i32) -> i32 {
    %c0_i32 = arith.constant 0 : i32
    %c0_i32_0 = arith.constant 0 : i32
    return %c0_i32 : i32
  }
  func.func @transform_2(%arg0: i32) -> (i32, i32) {
    %c0_i32 = arith.constant 0 : i32
    %c0_i32_0 = arith.constant 0 : i32
    return %c0_i32, %arg0 : i32, i32
  }
  func.func @transform_3(%arg0: i32) -> (i32, i32) {
    %c0_i32 = arith.constant 0 : i32
    %c0_i32_0 = arith.constant 0 : i32
    return %c0_i32, %arg0 : i32, i32
  }
}

</mosaic_0001>

<bundles_post_ra>
// kernel: tpu_custom_call.1
= control target key start
LH: loop header
LB: loop body
LE: loop exit
PB: predicated region body
PF: predicated region fallthrough
CT: control target
= control target key end

     0   :  { %8 = vsyncpa [#allocation5], 0  ;;  %s375_s0 = inlined_call_operand.hbm [shape: f32[3,5], index: 0, kind: input, shape index: {}]   ;;  %s376_s1 = inlined_call_operand.vmem [shape: f32[3], index: 1, kind: input, shape index: {}]   ;;  %s377_s2 = inlined_call_operand.hbm [shape: f32[5,8], index: 2, kind: input, shape index: {}]   ;;  %s378_s3 = inlined_call_operand.hbm [shape: f32[3,8], index: 3, kind: output, shape index: {}]  }
   0x1   :  { %9 = vsyncpa [#allocation6], 0 }
   0x2   :  { %10 = vsyncpa [#allocation3], 0 }
   0x3   :  { %11 = vsyncpa [#allocation4], 0  ;;  %s26_s14 = sshll.u32 %s376_s1, 4  ;;  %s202_s17 = scalar_lea.hbm %s375_s0, 64  ;;  %s27_s14 = int_to_ptr.vmem [resolvable:$true] %s26_s14 }
   0x4   :  { %p203_p0 = scmp.ne.s32.totalorder %s375_s0, %s202_s17  ;;  %p206_p1 = scmp.lt.u32.totalorder %s202_s17, %s375_s0 }
   0x6   :  { %p208_p2 = pnand %p206_p1, %p203_p0 }
   0x8   :  { %211 = shalt.err (!%p208_p2)
}
   0x9   :  { %s276_s22 = smov [#allocation2]   ;;  %s212_s1 = scalar_lea.vmem %s27_s14, 16 }
   0xa   :  { %19 = dma.hbm_to_smem %s375_s0, 64, %s276_s22, [#allocation5]  }
   0xb   :  { %p213_p3 = scmp.ne.s32.totalorder %s27_s14, %s212_s1  ;;  %p217_p4 = scmp.lt.s32.totalorder %s27_s14, %s27_s14 }
   0xc   :  { %p218_p5 = scmp.lt.s32.totalorder %s212_s1, %s212_s1 }
   0xe   :  { %p219_p6 = por %p218_p5, %p217_p4 }
  0x10   :  { %p220_p7 = pnand %p219_p6, %p213_p3 }
  0x12   :  { %223 = shalt.err (!%p220_p7)
}
  0x13   :  { %s277_s25 = smov [#allocation7]   ;;  %s278_s26 = smov [#allocation8]  }
  0x14   :  { %29 = dma.vmem_to_smem %s27_s14, 16, %s277_s25, [#allocation6]  }
  0x15   :  { %s36_s27 = sshll.u32 %s278_s26, 4  ;;  %s224_s30 = scalar_lea.hbm %s377_s2, 128  ;;  %s37_s27 = int_to_ptr.vmem [resolvable:$true] %s36_s27 }
  0x16   :  { %p225_p8 = scmp.ne.s32.totalorder %s377_s2, %s224_s30  ;;  %p228_p9 = scmp.lt.u32.totalorder %s224_s30, %s377_s2 }
  0x18   :  { %p230_p10 = pnand %p228_p9, %p225_p8 }
  0x1a   :  { %233 = shalt.err (!%p230_p10)
}
  0x1b   :  { %s234_s7 = scalar_lea.vmem %s37_s27, 128  ;;  %p239_p12 = scmp.lt.s32.totalorder %s37_s27, %s37_s27 }
  0x1c   :  { %p235_p11 = scmp.ne.s32.totalorder %s37_s27, %s234_s7  ;;  %p240_p13 = scmp.lt.s32.totalorder %s234_s7, %s234_s7 }
  0x1e   :  { %p241_p0 = por %p240_p13, %p239_p12 }
  0x20   :  { %p242_p1 = pnand %p241_p0, %p235_p11 }
  0x22   :  { %245 = shalt.err (!%p242_p1)
}
  0x23   :  { %39 = dma.hbm_to_vmem [thread:$0]  %s377_s2, 128, %s37_s27, [#allocation3]  }
  0x24   :  { %268 = dma.done.wait [#allocation5], 64  }
  0x25   :  { %269 = vsyncadd [#allocation5], 4294967232 }
  0x26   :  { %270 = dma.done.wait [#allocation6], 16  }
  0x27   :  { %271 = vsyncadd [#allocation6], 4294967280 }
  0x28   :  { %272 = dma.done.wait [#allocation3], 128  }
  0x29   :  { %273 = vsyncadd [#allocation3], 4294967168 }
  0x2a   :  { %49 = sfence }
  0x2b   :  { %s50_s10 = sld [smem:[#allocation2]]  ;;  %s170_s11 = sld [smem:[#allocation2 + $0x1]]  ;;  %v51_v0 = vld [vmem:[#allocation8] sm:$0x1]  ;;  %v55_v1 = vld [vmem:[#allocation8 + $0x1] sm:$0x1] }
  0x2c   :  { %s171_s12 = sld [smem:[#allocation2 + $0x2]]  ;;  %s172_s13 = sld [smem:[#allocation2 + $0x3]]  ;;  %v60_v2 = vld [vmem:[#allocation8 + $0x2] sm:$0x1]  ;;  %v65_v5 = vld [vmem:[#allocation8 + $0x3] sm:$0x1] }
  0x2d   :  { %s173_s14 = sld [smem:[#allocation2 + $0x4]]  ;;  %s327_s15 = sld [smem:[#allocation2 + $0x80]]  ;;  %v70_v9 = vld [vmem:[#allocation8 + $0x4] sm:$0x1]  ;;  %v86_v13 = vld [vmem:[#allocation8] sm:$0x1] }
  0x2e   :  { %s329_s16 = sld [smem:[#allocation2 + $0x81]]  ;;  %s331_s2 = sld [smem:[#allocation7]]  ;;  %v90_v14 = vld [vmem:[#allocation8 + $0x1] sm:$0x1]  ;;  %v95_v17 = vld [vmem:[#allocation8 + $0x2] sm:$0x1] }
  0x2f   :  { %s333_s17 = sld [smem:[#allocation2 + $0x82]]  ;;  %s335_s18 = sld [smem:[#allocation2 + $0x83]]  ;;  %v100_v21 = vld [vmem:[#allocation8 + $0x3] sm:$0x1]  ;;  %v105_v26 = vld [vmem:[#allocation8 + $0x4] sm:$0x1] }
  0x30   :  { %s337_s19 = sld [smem:[#allocation2 + $0x84]]  ;;  %s339_s20 = sld [smem:[#allocation2 + $0x100]]  ;;  %v120_v30 = vld [vmem:[#allocation8] sm:$0x1]  ;;  %v124_v31 = vld [vmem:[#allocation8 + $0x1] sm:$0x1] }
  0x31   :  { %v52_v3 = vstv %s50_s10  ;;  %v56_v4 = vstv %s170_s11  ;;  %s341_s21 = sld [smem:[#allocation2 + $0x101]]  ;;  %s343_s22 = sld [smem:[#allocation2 + $0x102]]  ;;  %v129_v39 = vld [vmem:[#allocation8 + $0x2] sm:$0x1]  ;;  %v134_v44 = vld [vmem:[#allocation8 + $0x3] sm:$0x1] }
  0x32   :  { %v53_v6 = vmul.f32 %v52_v3, %v51_v0  ;;  %v57_v7 = vmul.f32 %v56_v4, %v55_v1  ;;  %v61_v8 = vstv %s171_s12  ;;  %v66_v11 = vstv %s172_s13  ;;  %s345_s23 = sld [smem:[#allocation2 + $0x103]]  ;;  %s349_s24 = sld [smem:[#allocation7 + $0x1]]  ;;  %v139_v47 = vld [vmem:[#allocation8 + $0x4] sm:$0x1] }
  0x33   :  { %v62_v10 = vmul.f32 %v61_v8, %v60_v2  ;;  %v71_v12 = vstv %s173_s14  ;;  %v67_v16 = vmul.f32 %v66_v11, %v65_v5  ;;  %v87_v19 = vstv %s327_s15  ;;  %s351_s1 = sld [smem:[#allocation2 + $0x104]]  ;;  %s185_s25 = sld [smem:[#allocation7 + $0x2]] }
  0x34   :  { %v58_v15 = vadd.f32 %v57_v7, %v53_v6  ;;  %v72_v18 = vmul.f32 %v71_v12, %v70_v9  ;;  %v91_v20 = vstv %s329_s16  ;;  %v88_v23 = vmul.f32 %v87_v19, %v86_v13  ;;  %s279_s26 = smov [#allocation9]  }
  0x35   :  { %v92_v24 = vmul.f32 %v91_v20, %v90_v14  ;;  %v96_v25 = vstv %s333_s17  ;;  %v101_v28 = vstv %s335_s18  ;;  %v75_v35 = vstv %s331_s2  ;;  %s159_s27 = sshll.u32 %s279_s26, 4  ;;  %s160_s27 = int_to_ptr.vmem [resolvable:$true] %s159_s27 }
  0x36   :  { %v63_v22 = vadd.f32 %v62_v10, %v58_v15  ;;  %v97_v27 = vmul.f32 %v96_v25, %v95_v17  ;;  %v106_v29 = vstv %s337_s19  ;;  %v102_v34 = vmul.f32 %v101_v28, %v100_v21  ;;  %s246_s28 = scalar_lea.vmem %s160_s27, 64  ;;  %p251_p3 = scmp.lt.s32.totalorder %s160_s27, %s160_s27 }
  0x37   :  { %v93_v33 = vadd.f32 %v92_v24, %v88_v23  ;;  %v107_v36 = vmul.f32 %v106_v29, %v105_v26  ;;  %v121_v37 = vstv %s339_s20  ;;  %v125_v38 = vstv %s341_s21  ;;  %p247_p2 = scmp.ne.s32.totalorder %s160_s27, %s246_s28  ;;  %p252_p4 = scmp.lt.s32.totalorder %s246_s28, %s246_s28 }
  0x38   :  { %v68_v32 = vadd.f32 %v67_v16, %v63_v22  ;;  %v122_v42 = vmul.f32 %v121_v37, %v120_v30  ;;  %v126_v43 = vmul.f32 %v125_v38, %v124_v31  ;;  %v130_v45 = vstv %s343_s22 }
  0x39   :  { %v98_v41 = vadd.f32 %v97_v27, %v93_v33  ;;  %v135_v46 = vstv %s345_s23  ;;  %v140_v48 = vstv %s351_s1  ;;  %v131_v52 = vmul.f32 %v130_v45, %v129_v39  ;;  %p253_p5 = por %p252_p4, %p251_p3 }
  0x3a   :  { %v73_v40 = vadd.f32 %v72_v18, %v68_v32  ;;  %v127_v51 = vadd.f32 %v126_v43, %v122_v42  ;;  %v110_v53 = vstv %s349_s24  ;;  %v136_v54 = vmul.f32 %v135_v46, %v134_v44 }
  0x3b   :  { %v103_v50 = vadd.f32 %v102_v34, %v98_v41  ;;  %v141_v58 = vmul.f32 %v140_v48, %v139_v47  ;;  %v144_v62 = vstv %s185_s25  ;;  %vm83_vm0 = vcmask 57344   ;;  %p254_p6 = pnand %p253_p5, %p247_p2 }
  0x3c   :  { %v76_v49 = vadd.f32 %v75_v35, %v73_v40  ;;  %v132_v57 = vadd.f32 %v131_v52, %v127_v51 }
  0x3d   :  { %v108_v56 = vadd.f32 %v107_v36, %v103_v50 }
  0x3e   :  { %v77_v55 = vsub.f32 0.0, %v76_v49  ;;  %v137_v61 = vadd.f32 %v136_v54, %v132_v57 }
  0x3f   :  { %v111_v60 = vadd.f32 %v110_v53, %v108_v56 }
  0x40   :  { %v78_v59 = vmul.f32 1.442695, %v77_v55  ;;  %v142_v0 = vadd.f32 %v141_v58, %v137_v61 }
  0x41   :  { %v112_v63 = vsub.f32 0.0, %v111_v60 }
  0x42   :  { %190 = vpow2.f32 %v78_v59  ;;  %v145_v2 = vadd.f32 %v144_v62, %v142_v0 }
  0x43   :  { %v113_v1 = vmul.f32 1.442695, %v112_v63 }
  0x44   :  { %v146_v3 = vsub.f32 0.0, %v145_v2 }
  0x45   :  { %192 = vpow2.f32 %v113_v1 }
  0x46   :  { %v147_v4 = vmul.f32 1.442695, %v146_v3 }
  0x48   :  { %194 = vpow2.f32 %v147_v4 }
  0x4c   :  { %v191_v5 = vpop.eup %190 }
  0x4d   :  { %v80_v6 = vadd.f32 1.0, %v191_v5 }
  0x4f   :  { %196 = vrcp.f32 %v80_v6  ;;  %v193_v7 = vpop.eup %192 }
  0x50   :  { %v115_v8 = vadd.f32 1.0, %v193_v7 }
  0x52   :  { %198 = vrcp.f32 %v115_v8  ;;  %v195_v9 = vpop.eup %194 }
  0x53   :  { %v149_v10 = vadd.f32 1.0, %v195_v9 }
  0x55   :  { %200 = vrcp.f32 %v149_v10 }
  0x59   :  { %v197_v11 = vpop.eup %196 }
  0x5a   :  { %84 = vst.msk [vmem:[#allocation9] sm:$0x1] %vm83_vm0, %v197_v11 }
  0x5c   :  { %v199_v12 = vpop.eup %198 }
  0x5d   :  { %118 = vst.msk [vmem:[#allocation9 + $0x1] sm:$0x1] %vm83_vm0, %v199_v12 }
  0x5f   :  { %v201_v13 = vpop.eup %200 }
  0x60   :  { %152 = vst.msk [vmem:[#allocation9 + $0x2] sm:$0x1] %vm83_vm0, %v201_v13 }
  0x61   :  { %257 = shalt.err (!%p254_p6)
}
  0x62   :  { %s258_s4 = scalar_lea.hbm %s378_s3, 64 }
  0x63   :  { %p259_p7 = scmp.ne.s32.totalorder %s378_s3, %s258_s4  ;;  %p262_p8 = scmp.lt.u32.totalorder %s258_s4, %s378_s3 }
  0x65   :  { %p264_p9 = pnand %p262_p8, %p259_p7 }
  0x67   :  { %267 = shalt.err (!%p264_p9)
}
  0x68   :  { %162 = dma.vmem_to_hbm [thread:$0]  %s160_s27, 64, %s378_s3, [#allocation4]  }
  0x69   :  { %274 = dma.done.wait [#allocation4], 64  }
  0x6a   :  { %275 = vsyncadd [#allocation4], 4294967232 }
  0x6b   :  { %166 = vsyncpa [#allocation3], 1 }
  0x6c   :  { %167 = vsyncpa [#allocation4], 1 }
  0x6d   :  { %168 = vsyncpa [#allocation5], 1 }
  0x6e   :  { %169 = vsyncpa [#allocation6], 1 }

</bundles_post_ra>
